<compile_context>
chip_gen: v5e
topology: v5e:2x2
jax: 0.10.0
libtpu: 0.0.40
codegen_flags: <defaults>
</compile_context>

<pallas_src>
import jax
import jax.numpy as jnp
import numpy as np
from jax import lax
from jax.experimental import pallas as pl
from jax.experimental.pallas import tpu as pltpu

MOMENTUM = 0.995
TEMPERATURE = 0.07

# EMA slab layout: lane-dense 512-wide slab, 512x512 f32 tiles (1 MiB / block).
EMA_LANES = 512
EMA_ROW_TILE = 512


def _vmem_spec():
    return pl.BlockSpec(memory_space=pltpu.MemorySpace.VMEM)


# --------------------------- Momentum EMA kernel ------------------------------

def momentum_ema_kernel(m_ref, p_ref, o_ref):
    o_ref[...] = MOMENTUM * m_ref[...] + (1.0 - MOMENTUM) * p_ref[...]


def _to_slab(leaves):
    """Flatten + concat all leaves into one lane-dense (rows, 512) f32 slab."""
    flat = jnp.concatenate([l.reshape(-1) for l in leaves])
    n = int(flat.shape[0])
    rows = -(-n // EMA_LANES)
    if rows > EMA_ROW_TILE:
        rows = -(-rows // EMA_ROW_TILE) * EMA_ROW_TILE   # grid divides evenly
    else:
        rows = max(8, -(-rows // 8) * 8)                  # sublane-aligned
    pad = rows * EMA_LANES - n
    if pad:
        flat = jnp.pad(flat, (0, pad))
    return flat.reshape(rows, EMA_LANES)


def _from_slab(slab, leaves_template):
    flat = slab.reshape(-1)
    out, off = [], 0
    for l in leaves_template:
        sz = int(np.prod(l.shape))
        out.append(flat[off:off + sz].reshape(l.shape))
        off += sz
    return out


def fused_momentum_update(momentum_tree, param_tree):
    """One gridded, aliased EMA kernel over ALL momentum-encoder params."""
    m_leaves, treedef = jax.tree_util.tree_flatten(momentum_tree)
    p_leaves, _ = jax.tree_util.tree_flatten(param_tree)

    slab_m = _to_slab(m_leaves)
    slab_p = _to_slab(p_leaves)
    rows = slab_m.shape[0]
    row_tile = EMA_ROW_TILE if rows >= EMA_ROW_TILE else rows
    grid = (rows // row_tile,)

    spec = pl.BlockSpec((row_tile, EMA_LANES), lambda i: (i, 0))
    out = pl.pallas_call(
        momentum_ema_kernel,
        out_shape=jax.ShapeDtypeStruct(slab_m.shape, slab_m.dtype),
        grid=grid,
        in_specs=[spec, spec],
        out_specs=spec,
        input_output_aliases={0: 0},          # update momentum slab in place
        compiler_params=pltpu.CompilerParams(
            dimension_semantics=("parallel",)),
    )(slab_m, slab_p)

    new_leaves = _from_slab(out, m_leaves)
    return jax.tree_util.tree_unflatten(treedef, new_leaves)


# --------------------------- Contrastive-loss kernel --------------------------

def itcl_loss_kernel(img_ref, txt_ref, mimg_ref, mtxt_ref,
                     wi_ref, wt_ref, wmi_ref, wmt_ref,
                     bi_ref, bt_ref, bmi_ref, bmt_ref,
                     loss_ref):
    """4 projections + L2 normalize + 3 sims (1/T folded) + cross-entropy."""
    batch = img_ref.shape[0]
    inv_t = jnp.float32(1.0 / TEMPERATURE)

    def project_normalize(f_ref, w_ref, b_ref, scale):
        # TODO(synk): cast operands to bf16 at HF scale (keep f32 accumulate).
        p = jnp.dot(f_ref[...], w_ref[...],
                    preferred_element_type=jnp.float32) + b_ref[...]
        # F.normalize(dim=-1, eps=1e-12) == p * rsqrt(max(sum(p^2), eps^2));
        # padded lanes are exactly zero so norms/contractions are unaffected.
        ss = jnp.sum(p * p, axis=-1, keepdims=True)
        return p * (scale * lax.rsqrt(jnp.maximum(ss, jnp.float32(1e-24))))

    # fold 1/T into the left operands of the three similarity matmuls
    ip  = project_normalize(img_ref,  wi_ref,  bi_ref,  inv_t)
    tp  = project_normalize(txt_ref,  wt_ref,  bt_ref,  jnp.float32(1.0))
    mip = project_normalize(mimg_ref, wmi_ref, bmi_ref, inv_t)
    mtp = project_normalize(mtxt_ref, wmt_ref, bmt_ref, jnp.float32(1.0))

    tp_t = tp.T            # single transpose, reused by the two sims using tp
    mtp_t = mtp.T

    def ce_sum(a, b, b_t):
        # sim = a @ b.T (1/T already folded into a); CE vs labels = arange(B).
        sim = jnp.dot(a, b_t, preferred_element_type=jnp.float32)
        # diagonal of sim == rowwise dot; O(B*P) VPU work, no iota masks.
        diag = jnp.sum(a * b, axis=-1, keepdims=True)
        m = jnp.max(sim, axis=-1, keepdims=True)
        lse = m + jnp.log(jnp.sum(jnp.exp(sim - m), axis=-1, keepdims=True))
        return jnp.sum(lse - diag, axis=0, keepdims=True)    # (1, 1)

    total = ce_sum(ip, tp, tp_t) + ce_sum(ip, mtp, mtp_t) + ce_sum(mip, tp, tp_t)
    loss_ref[...] = total / (3.0 * batch)


def itcl_loss(img_feat, txt_feat, m_img_feat, m_txt_feat, proj_params):
    pp = proj_params
    hid, proj_dim = pp["img_w"].shape
    p_pad = -(-proj_dim // 128) * 128

    def pad_w(w):
        return w if p_pad == proj_dim else jnp.pad(w, ((0, 0), (0, p_pad - proj_dim)))

    def pad_b(b):
        return b if p_pad == proj_dim else jnp.pad(b, ((0, 0), (0, p_pad - proj_dim)))

    B = int(img_feat.shape[0])
    cost = pl.CostEstimate(
        flops=4 * 2 * B * hid * p_pad + 3 * 2 * B * B * p_pad
              + 16 * B * p_pad + 9 * B * B,
        transcendentals=3 * B * B + 3 * B + 4 * B,
        bytes_accessed=4 * (4 * B * hid + 4 * hid * p_pad + 4 * p_pad + 1),
    )

    # TODO(synk): at HF scale add a query-row-tiled grid ("parallel") and an
    # explicit vmem_limit_bytes; gridless whole-array blocks are optimal here.
    out = pl.pallas_call(
        itcl_loss_kernel,
        out_shape=jax.ShapeDtypeStruct((1, 1), jnp.float32),
        in_specs=[_vmem_spec()] * 12,
        out_specs=_vmem_spec(),
        cost_estimate=cost,
    )(img_feat, txt_feat, m_img_feat, m_txt_feat,
      pad_w(pp["img_w"]), pad_w(pp["txt_w"]),
      pad_w(pp["m_img_w"]), pad_w(pp["m_txt_w"]),
      pad_b(pp["img_b"]), pad_b(pp["txt_b"]),
      pad_b(pp["m_img_b"]), pad_b(pp["m_txt_b"]))
    return out[0, 0]


# --------------------------- Synthetic encoders (JAX glue) -------------------
# TODO(synk): the original module wraps arbitrary HF image/text encoders; they
# are replaced here by small deterministic synthetic encoders.

def encode_image(images, enc):
    x = images.reshape(images.shape[0], -1)          # [B, C*H*W]
    return jnp.tanh(x @ enc["w"] + enc["b"])         # [B, hidden]  (== CLS feature)


def encode_text(input_ids, attention_mask, enc):
    emb = enc["emb"][input_ids]                      # [B, L, hidden]
    mask = attention_mask[..., None].astype(jnp.float32)
    pooled = (emb * mask).sum(1) / jnp.maximum(mask.sum(1), 1.0)
    return jnp.tanh(pooled @ enc["w"] + enc["b"])    # [B, hidden]  (== CLS feature)


# --------------------------- Full forward -----------------------------------

def forward(params, images, input_ids, attention_mask):
    # encoder features (requires-grad branch)
    img_feat = encode_image(images, params["img_enc"])
    txt_feat = encode_text(input_ids, attention_mask, params["txt_enc"])

    # single fused, aliased EMA kernel over ALL encoder params of both
    # momentum encoders.  NOTE: the projection heads are intentionally NOT
    # synced/updated, faithful to the reference module.  The pre-update
    # momentum buffers are donated/aliased and must not be reused afterwards.
    new_m = fused_momentum_update(
        {"img": params["m_img_enc"], "txt": params["m_txt_enc"]},
        {"img": params["img_enc"], "txt": params["txt_enc"]})
    new_m_img_enc, new_m_txt_enc = new_m["img"], new_m["txt"]

    m_img_feat = encode_image(images, new_m_img_enc)
    m_txt_feat = encode_text(input_ids, attention_mask, new_m_txt_enc)

    loss = itcl_loss(img_feat, txt_feat, m_img_feat, m_txt_feat, params["proj"])
    new_params = dict(params, m_img_enc=new_m_img_enc, m_txt_enc=new_m_txt_enc)
    return loss, new_params


# --------------------------- Pure-JAX reference ------------------------------

def reference_forward(params, images, input_ids, attention_mask):
    def normalize(x):
        return x / jnp.maximum(jnp.linalg.norm(x, axis=-1, keepdims=True), 1e-12)

    img_feat = encode_image(images, params["img_enc"])
    txt_feat = encode_text(input_ids, attention_mask, params["txt_enc"])

    m_img_enc = {k: MOMENTUM * params["m_img_enc"][k] + (1 - MOMENTUM) * params["img_enc"][k]
                 for k in params["img_enc"]}
    m_txt_enc = {k: MOMENTUM * params["m_txt_enc"][k] + (1 - MOMENTUM) * params["txt_enc"][k]
                 for k in params["txt_enc"]}
    m_img_feat = encode_image(images, m_img_enc)
    m_txt_feat = encode_text(input_ids, attention_mask, m_txt_enc)

    pp = params["proj"]
    ip = normalize(img_feat @ pp["img_w"] + pp["img_b"])
    tp = normalize(txt_feat @ pp["txt_w"] + pp["txt_b"])
    mip = normalize(m_img_feat @ pp["m_img_w"] + pp["m_img_b"])
    mtp = normalize(m_txt_feat @ pp["m_txt_w"] + pp["m_txt_b"])

    def ce(sim):
        labels = jnp.arange(sim.shape[0])
        logp = jax.nn.log_softmax(sim, axis=-1)
        return -jnp.mean(logp[jnp.arange(sim.shape[0]), labels])

    s1 = ip @ tp.T / TEMPERATURE
    s2 = ip @ mtp.T / TEMPERATURE
    s3 = mip @ tp.T / TEMPERATURE
    return (ce(s1) + ce(s2) + ce(s3)) / 3.0


# --------------------------- Setup / main ------------------------------------

def make_params(key, *, channels, spatial, hidden, proj_dim, vocab):
    ks = jax.random.split(key, 12)
    img_in = channels * spatial * spatial

    def linear(kw, kb, fan_in, fan_out):
        bound = 1.0 / np.sqrt(fan_in)
        w = jax.random.uniform(kw, (fan_in, fan_out), jnp.float32, -bound, bound)
        b = jax.random.uniform(kb, (1, fan_out), jnp.float32, -bound, bound)
        return w, b

    img_w, img_b = linear(ks[0], ks[1], img_in, hidden)
    txt_w, txt_b = linear(ks[2], ks[3], hidden, hidden)
    emb = jax.random.normal(ks[4], (vocab, hidden), jnp.float32) * 0.02

    img_enc = {"w": img_w, "b": img_b}
    txt_enc = {"emb": emb, "w": txt_w, "b": txt_b}
    # momentum encoders initialized as exact copies (as in the module)
    m_img_enc = {k: v for k, v in img_enc.items()}
    m_txt_enc = {k: v for k, v in txt_enc.items()}

    pi_w, pi_b = linear(ks[5], ks[6], hidden, proj_dim)
    pt_w, pt_b = linear(ks[7], ks[8], hidden, proj_dim)
    # momentum projection heads are independently initialized (as in the module)
    pmi_w, pmi_b = linear(ks[9], ks[10], hidden, proj_dim)
    pmt_w, pmt_b = linear(ks[11], ks[0], hidden, proj_dim)

    proj = {"img_w": pi_w, "img_b": pi_b, "txt_w": pt_w, "txt_b": pt_b,
            "m_img_w": pmi_w, "m_img_b": pmi_b, "m_txt_w": pmt_w, "m_txt_b": pmt_b}

    return {"img_enc": img_enc, "txt_enc": txt_enc,
            "m_img_enc": m_img_enc, "m_txt_enc": m_txt_enc, "proj": proj}


if __name__ == "__main__":
    B, C, S, L, HID, PROJ, VOCAB = 8, 4, 16, 8, 32, 16, 64

    key = jax.random.PRNGKey(0)
    k_params, k_img, k_ids, k_mask = jax.random.split(key, 4)

    params = make_params(k_params, channels=C, spatial=S, hidden=HID,
                         proj_dim=PROJ, vocab=VOCAB)

    images = jax.random.normal(k_img, (B, C, S, S), jnp.float32)      # NCHW
    input_ids = jax.random.randint(k_ids, (B, L), 0, VOCAB, jnp.int32)
    attention_mask = (jax.random.uniform(k_mask, (B, L)) > 0.2).astype(jnp.int32)
    attention_mask = attention_mask.at[:, 0].set(1)                    # keep CLS-ish token

    forward_jit = jax.jit(forward)
    loss, _ = forward_jit(params, images, input_ids, attention_mask)
    loss = jax.block_until_ready(loss)

    ref = jax.block_until_ready(
        reference_forward(params, images, input_ids, attention_mask))

    np.testing.assert_allclose(np.asarray(loss), np.asarray(ref), rtol=1e-4, atol=1e-5)
    print("KERNEL_OK")
</pallas_src>

<mosaic_0001>
module attributes {stable_mosaic.version = 11 : i64} {
  func.func @momentum_ema_kernel(%arg0: i32, %arg1: memref<72x512xf32, #tpu.memory_space<vmem>>, %arg2: memref<72x512xf32, #tpu.memory_space<vmem>>, %arg3: memref<72x512xf32, #tpu.memory_space<vmem>>) attributes {dimension_semantics = [#tpu.dimension_semantics<parallel>], iteration_bounds = array<i64: 1>, scalar_prefetch = 0 : i64, scratch_operands = 0 : i64, tpu.core_type = #tpu.core_type<tc>, window_params = [{transform_indices = @transform_0, window_bounds = array<i64: 72, 512>}, {transform_indices = @transform_1, window_bounds = array<i64: 72, 512>}, {transform_indices = @transform_2, window_bounds = array<i64: 72, 512>}]} {
    %c0 = arith.constant 0 : index
    %c0_0 = arith.constant 0 : index
    %0 = vector.load %arg1[%c0, %c0_0] : memref<72x512xf32, #tpu.memory_space<vmem>>, vector<72x512xf32>
    %cst = arith.constant 9.950000e-01 : f32
    %1 = vector.broadcast %cst : f32 to vector<72x512xf32>
    %2 = arith.mulf %1, %0 : vector<72x512xf32>
    %c0_1 = arith.constant 0 : index
    %c0_2 = arith.constant 0 : index
    %3 = vector.load %arg2[%c0_1, %c0_2] : memref<72x512xf32, #tpu.memory_space<vmem>>, vector<72x512xf32>
    %cst_3 = arith.constant 5.000000e-03 : f32
    %4 = vector.broadcast %cst_3 : f32 to vector<72x512xf32>
    %5 = arith.mulf %4, %3 : vector<72x512xf32>
    %6 = arith.addf %2, %5 : vector<72x512xf32>
    %c0_4 = arith.constant 0 : index
    %c0_5 = arith.constant 0 : index
    %7 = vector.load %arg3[%c0_4, %c0_5] : memref<72x512xf32, #tpu.memory_space<vmem>>, vector<72x512xf32>
    tpu.vector_store %arg3[%c0_4, %c0_5], %6 {strides = array<i32>} : memref<72x512xf32, #tpu.memory_space<vmem>>, vector<72x512xf32>,
    return
  }
  func.func @transform_0(%arg0: i32) -> (i32, i32) {
    %c0_i32 = arith.constant 0 : i32
    %c0_i32_0 = arith.constant 0 : i32
    return %arg0, %c0_i32 : i32, i32
  }
  func.func @transform_1(%arg0: i32) -> (i32, i32) {
    %c0_i32 = arith.constant 0 : i32
    %c0_i32_0 = arith.constant 0 : i32
    return %arg0, %c0_i32 : i32, i32
  }
  func.func @transform_2(%arg0: i32) -> (i32, i32) {
    %c0_i32 = arith.constant 0 : i32
    %c0_i32_0 = arith.constant 0 : i32
    return %arg0, %c0_i32 : i32, i32
  }
}

module attributes {stable_mosaic.version = 11 : i64} {
  func.func @itcl_loss_kernel(%arg0: memref<8x32xf32, #tpu.memory_space<vmem>>, %arg1: memref<8x32xf32, #tpu.memory_space<vmem>>, %arg2: memref<8x32xf32, #tpu.memory_space<vmem>>, %arg3: memref<8x32xf32, #tpu.memory_space<vmem>>, %arg4: memref<32x128xf32, #tpu.memory_space<vmem>>, %arg5: memref<32x128xf32, #tpu.memory_space<vmem>>, %arg6: memref<32x128xf32, #tpu.memory_space<vmem>>, %arg7: memref<32x128xf32, #tpu.memory_space<vmem>>, %arg8: memref<1x128xf32, #tpu.memory_space<vmem>>, %arg9: memref<1x128xf32, #tpu.memory_space<vmem>>, %arg10: memref<1x128xf32, #tpu.memory_space<vmem>>, %arg11: memref<1x128xf32, #tpu.memory_space<vmem>>, %arg12: memref<1x1xf32, #tpu.memory_space<vmem>>) attributes {dimension_semantics = [], scalar_prefetch = 0 : i64, scratch_operands = 0 : i64, tpu.core_type = #tpu.core_type<tc>} {
    %c0 = arith.constant 0 : index
    %c0_0 = arith.constant 0 : index
    %0 = vector.load %arg0[%c0, %c0_0] : memref<8x32xf32, #tpu.memory_space<vmem>>, vector<8x32xf32>
    %c0_1 = arith.constant 0 : index
    %c0_2 = arith.constant 0 : index
    %1 = vector.load %arg4[%c0_1, %c0_2] : memref<32x128xf32, #tpu.memory_space<vmem>>, vector<32x128xf32>
    %cst = arith.constant dense<0.000000e+00> : vector<8x128xf32>
    %2 = tpu.matmul %0, %1, %cst {dimension_numbers = #tpu.dot_dimension_numbers<[1], [0], [0], [1], [0, 0, 1, 1], [], []>} : vector<8x32xf32>, vector<32x128xf32>, vector<8x128xf32> -> vector<8x128xf32>
    %c0_3 = arith.constant 0 : index
    %c0_4 = arith.constant 0 : index
    %3 = vector.load %arg8[%c0_3, %c0_4] : memref<1x128xf32, #tpu.memory_space<vmem>>, vector<1x128xf32>
    %4 = vector.broadcast %3 : vector<1x128xf32> to vector<8x128xf32>
    %5 = arith.addf %2, %4 : vector<8x128xf32>
    %6 = arith.mulf %5, %5 : vector<8x128xf32>
    %cst_5 = arith.constant dense<0.000000e+00> : vector<8xf32>
    %7 = vector.multi_reduction <add>, %6, %cst_5 [1] : vector<8x128xf32> to vector<8xf32>
    %8 = vector.shape_cast %7 : vector<8xf32> to vector<8x1xf32>
    %cst_6 = arith.constant 1.000000e-24 : f32
    %9 = vector.broadcast %cst_6 : f32 to vector<8x1xf32>
    %10 = arith.maximumf %8, %9 : vector<8x1xf32>
    %11 = math.rsqrt %10 : vector<8x1xf32>
    %cst_7 = arith.constant 14.2857141 : f32
    %12 = vector.broadcast %cst_7 : f32 to vector<8x1xf32>
    %13 = arith.mulf %12, %11 : vector<8x1xf32>
    %14 = vector.broadcast %13 : vector<8x1xf32> to vector<8x128xf32>
    %15 = arith.mulf %5, %14 : vector<8x128xf32>
    %c0_8 = arith.constant 0 : index
    %c0_9 = arith.constant 0 : index
    %16 = vector.load %arg1[%c0_8, %c0_9] : memref<8x32xf32, #tpu.memory_space<vmem>>, vector<8x32xf32>
    %c0_10 = arith.constant 0 : index
    %c0_11 = arith.constant 0 : index
    %17 = vector.load %arg5[%c0_10, %c0_11] : memref<32x128xf32, #tpu.memory_space<vmem>>, vector<32x128xf32>
    %cst_12 = arith.constant dense<0.000000e+00> : vector<8x128xf32>
    %18 = tpu.matmul %16, %17, %cst_12 {dimension_numbers = #tpu.dot_dimension_numbers<[1], [0], [0], [1], [0, 0, 1, 1], [], []>} : vector<8x32xf32>, vector<32x128xf32>, vector<8x128xf32> -> vector<8x128xf32>
    %c0_13 = arith.constant 0 : index
    %c0_14 = arith.constant 0 : index
    %19 = vector.load %arg9[%c0_13, %c0_14] : memref<1x128xf32, #tpu.memory_space<vmem>>, vector<1x128xf32>
    %20 = vector.broadcast %19 : vector<1x128xf32> to vector<8x128xf32>
    %21 = arith.addf %18, %20 : vector<8x128xf32>
    %22 = arith.mulf %21, %21 : vector<8x128xf32>
    %cst_15 = arith.constant dense<0.000000e+00> : vector<8xf32>
    %23 = vector.multi_reduction <add>, %22, %cst_15 [1] : vector<8x128xf32> to vector<8xf32>
    %24 = vector.shape_cast %23 : vector<8xf32> to vector<8x1xf32>
    %cst_16 = arith.constant 1.000000e-24 : f32
    %25 = vector.broadcast %cst_16 : f32 to vector<8x1xf32>
    %26 = arith.maximumf %24, %25 : vector<8x1xf32>
    %27 = math.rsqrt %26 : vector<8x1xf32>
    %cst_17 = arith.constant 1.000000e+00 : f32
    %28 = vector.broadcast %cst_17 : f32 to vector<8x1xf32>
    %29 = arith.mulf %28, %27 : vector<8x1xf32>
    %30 = vector.broadcast %29 : vector<8x1xf32> to vector<8x128xf32>
    %31 = arith.mulf %21, %30 : vector<8x128xf32>
    %c0_18 = arith.constant 0 : index
    %c0_19 = arith.constant 0 : index
    %32 = vector.load %arg2[%c0_18, %c0_19] : memref<8x32xf32, #tpu.memory_space<vmem>>, vector<8x32xf32>
    %c0_20 = arith.constant 0 : index
    %c0_21 = arith.constant 0 : index
    %33 = vector.load %arg6[%c0_20, %c0_21] : memref<32x128xf32, #tpu.memory_space<vmem>>, vector<32x128xf32>
    %cst_22 = arith.constant dense<0.000000e+00> : vector<8x128xf32>
    %34 = tpu.matmul %32, %33, %cst_22 {dimension_numbers = #tpu.dot_dimension_numbers<[1], [0], [0], [1], [0, 0, 1, 1], [], []>} : vector<8x32xf32>, vector<32x128xf32>, vector<8x128xf32> -> vector<8x128xf32>
    %c0_23 = arith.constant 0 : index
    %c0_24 = arith.constant 0 : index
    %35 = vector.load %arg10[%c0_23, %c0_24] : memref<1x128xf32, #tpu.memory_space<vmem>>, vector<1x128xf32>
    %36 = vector.broadcast %35 : vector<1x128xf32> to vector<8x128xf32>
    %37 = arith.addf %34, %36 : vector<8x128xf32>
    %38 = arith.mulf %37, %37 : vector<8x128xf32>
    %cst_25 = arith.constant dense<0.000000e+00> : vector<8xf32>
    %39 = vector.multi_reduction <add>, %38, %cst_25 [1] : vector<8x128xf32> to vector<8xf32>
    %40 = vector.shape_cast %39 : vector<8xf32> to vector<8x1xf32>
    %cst_26 = arith.constant 1.000000e-24 : f32
    %41 = vector.broadcast %cst_26 : f32 to vector<8x1xf32>
    %42 = arith.maximumf %40, %41 : vector<8x1xf32>
    %43 = math.rsqrt %42 : vector<8x1xf32>
    %cst_27 = arith.constant 14.2857141 : f32
    %44 = vector.broadcast %cst_27 : f32 to vector<8x1xf32>
    %45 = arith.mulf %44, %43 : vector<8x1xf32>
    %46 = vector.broadcast %45 : vector<8x1xf32> to vector<8x128xf32>
    %47 = arith.mulf %37, %46 : vector<8x128xf32>
    %c0_28 = arith.constant 0 : index
    %c0_29 = arith.constant 0 : index
    %48 = vector.load %arg3[%c0_28, %c0_29] : memref<8x32xf32, #tpu.memory_space<vmem>>, vector<8x32xf32>
    %c0_30 = arith.constant 0 : index
    %c0_31 = arith.constant 0 : index
    %49 = vector.load %arg7[%c0_30, %c0_31] : memref<32x128xf32, #tpu.memory_space<vmem>>, vector<32x128xf32>
    %cst_32 = arith.constant dense<0.000000e+00> : vector<8x128xf32>
    %50 = tpu.matmul %48, %49, %cst_32 {dimension_numbers = #tpu.dot_dimension_numbers<[1], [0], [0], [1], [0, 0, 1, 1], [], []>} : vector<8x32xf32>, vector<32x128xf32>, vector<8x128xf32> -> vector<8x128xf32>
    %c0_33 = arith.constant 0 : index
    %c0_34 = arith.constant 0 : index
    %51 = vector.load %arg11[%c0_33, %c0_34] : memref<1x128xf32, #tpu.memory_space<vmem>>, vector<1x128xf32>
    %52 = vector.broadcast %51 : vector<1x128xf32> to vector<8x128xf32>
    %53 = arith.addf %50, %52 : vector<8x128xf32>
    %54 = arith.mulf %53, %53 : vector<8x128xf32>
    %cst_35 = arith.constant dense<0.000000e+00> : vector<8xf32>
    %55 = vector.multi_reduction <add>, %54, %cst_35 [1] : vector<8x128xf32> to vector<8xf32>
    %56 = vector.shape_cast %55 : vector<8xf32> to vector<8x1xf32>
    %cst_36 = arith.constant 1.000000e-24 : f32
    %57 = vector.broadcast %cst_36 : f32 to vector<8x1xf32>
    %58 = arith.maximumf %56, %57 : vector<8x1xf32>
    %59 = math.rsqrt %58 : vector<8x1xf32>
    %cst_37 = arith.constant 1.000000e+00 : f32
    %60 = vector.broadcast %cst_37 : f32 to vector<8x1xf32>
    %61 = arith.mulf %60, %59 : vector<8x1xf32>
    %62 = vector.broadcast %61 : vector<8x1xf32> to vector<8x128xf32>
    %63 = arith.mulf %53, %62 : vector<8x128xf32>
    %64 = tpu.transpose %31, [1, 0] : vector<8x128xf32> -> vector<128x8xf32>
    %65 = tpu.transpose %63, [1, 0] : vector<8x128xf32> -> vector<128x8xf32>
    %cst_38 = arith.constant dense<0.000000e+00> : vector<8x8xf32>
    %66 = tpu.matmul %15, %64, %cst_38 {dimension_numbers = #tpu.dot_dimension_numbers<[1], [0], [0], [1], [0, 0, 1, 1], [], []>} : vector<8x128xf32>, vector<128x8xf32>, vector<8x8xf32> -> vector<8x8xf32>
    %67 = arith.mulf %15, %31 : vector<8x128xf32>
    %cst_39 = arith.constant dense<0.000000e+00> : vector<8xf32>
    %68 = vector.multi_reduction <add>, %67, %cst_39 [1] : vector<8x128xf32> to vector<8xf32>
    %69 = vector.shape_cast %68 : vector<8xf32> to vector<8x1xf32>
    %cst_40 = arith.constant dense<0xFF800000> : vector<8xf32>
    %70 = vector.multi_reduction <maximumf>, %66, %cst_40 [1] : vector<8x8xf32> to vector<8xf32>
    %71 = vector.shape_cast %70 : vector<8xf32> to vector<8x1xf32>
    %72 = vector.broadcast %71 : vector<8x1xf32> to vector<8x8xf32>
    %73 = arith.subf %66, %72 : vector<8x8xf32>
    %74 = math.exp %73 : vector<8x8xf32>
    %cst_41 = arith.constant dense<0.000000e+00> : vector<8xf32>
    %75 = vector.multi_reduction <add>, %74, %cst_41 [1] : vector<8x8xf32> to vector<8xf32>
    %76 = vector.shape_cast %75 : vector<8xf32> to vector<8x1xf32>
    %77 = math.log %76 : vector<8x1xf32>
    %78 = arith.addf %71, %77 : vector<8x1xf32>
    %79 = arith.subf %78, %69 : vector<8x1xf32>
    %cst_42 = arith.constant dense<0.000000e+00> : vector<1xf32>
    %80 = vector.multi_reduction <add>, %79, %cst_42 [0] : vector<8x1xf32> to vector<1xf32>
    %81 = vector.shape_cast %80 : vector<1xf32> to vector<1x1xf32>
    %cst_43 = arith.constant dense<0.000000e+00> : vector<8x8xf32>
    %82 = tpu.matmul %15, %65, %cst_43 {dimension_numbers = #tpu.dot_dimension_numbers<[1], [0], [0], [1], [0, 0, 1, 1], [], []>} : vector<8x128xf32>, vector<128x8xf32>, vector<8x8xf32> -> vector<8x8xf32>
    %83 = arith.mulf %15, %63 : vector<8x128xf32>
    %cst_44 = arith.constant dense<0.000000e+00> : vector<8xf32>
    %84 = vector.multi_reduction <add>, %83, %cst_44 [1] : vector<8x128xf32> to vector<8xf32>
    %85 = vector.shape_cast %84 : vector<8xf32> to vector<8x1xf32>
    %cst_45 = arith.constant dense<0xFF800000> : vector<8xf32>
    %86 = vector.multi_reduction <maximumf>, %82, %cst_45 [1] : vector<8x8xf32> to vector<8xf32>
    %87 = vector.shape_cast %86 : vector<8xf32> to vector<8x1xf32>
    %88 = vector.broadcast %87 : vector<8x1xf32> to vector<8x8xf32>
    %89 = arith.subf %82, %88 : vector<8x8xf32>
    %90 = math.exp %89 : vector<8x8xf32>
    %cst_46 = arith.constant dense<0.000000e+00> : vector<8xf32>
    %91 = vector.multi_reduction <add>, %90, %cst_46 [1] : vector<8x8xf32> to vector<8xf32>
    %92 = vector.shape_cast %91 : vector<8xf32> to vector<8x1xf32>
    %93 = math.log %92 : vector<8x1xf32>
    %94 = arith.addf %87, %93 : vector<8x1xf32>
    %95 = arith.subf %94, %85 : vector<8x1xf32>
    %cst_47 = arith.constant dense<0.000000e+00> : vector<1xf32>
    %96 = vector.multi_reduction <add>, %95, %cst_47 [0] : vector<8x1xf32> to vector<1xf32>
    %97 = vector.shape_cast %96 : vector<1xf32> to vector<1x1xf32>
    %98 = arith.addf %81, %97 : vector<1x1xf32>
    %cst_48 = arith.constant dense<0.000000e+00> : vector<8x8xf32>
    %99 = tpu.matmul %47, %64, %cst_48 {dimension_numbers = #tpu.dot_dimension_numbers<[1], [0], [0], [1], [0, 0, 1, 1], [], []>} : vector<8x128xf32>, vector<128x8xf32>, vector<8x8xf32> -> vector<8x8xf32>
    %100 = arith.mulf %47, %31 : vector<8x128xf32>
    %cst_49 = arith.constant dense<0.000000e+00> : vector<8xf32>
    %101 = vector.multi_reduction <add>, %100, %cst_49 [1] : vector<8x128xf32> to vector<8xf32>
    %102 = vector.shape_cast %101 : vector<8xf32> to vector<8x1xf32>
    %cst_50 = arith.constant dense<0xFF800000> : vector<8xf32>
    %103 = vector.multi_reduction <maximumf>, %99, %cst_50 [1] : vector<8x8xf32> to vector<8xf32>
    %104 = vector.shape_cast %103 : vector<8xf32> to vector<8x1xf32>
    %105 = vector.broadcast %104 : vector<8x1xf32> to vector<8x8xf32>
    %106 = arith.subf %99, %105 : vector<8x8xf32>
    %107 = math.exp %106 : vector<8x8xf32>
    %cst_51 = arith.constant dense<0.000000e+00> : vector<8xf32>
    %108 = vector.multi_reduction <add>, %107, %cst_51 [1] : vector<8x8xf32> to vector<8xf32>
    %109 = vector.shape_cast %108 : vector<8xf32> to vector<8x1xf32>
    %110 = math.log %109 : vector<8x1xf32>
    %111 = arith.addf %104, %110 : vector<8x1xf32>
    %112 = arith.subf %111, %102 : vector<8x1xf32>
    %cst_52 = arith.constant dense<0.000000e+00> : vector<1xf32>
    %113 = vector.multi_reduction <add>, %112, %cst_52 [0] : vector<8x1xf32> to vector<1xf32>
    %114 = vector.shape_cast %113 : vector<1xf32> to vector<1x1xf32>
    %115 = arith.addf %98, %114 : vector<1x1xf32>
    %cst_53 = arith.constant 2.400000e+01 : f32
    %116 = vector.broadcast %cst_53 : f32 to vector<1x1xf32>
    %117 = arith.divf %115, %116 : vector<1x1xf32>
    %c0_54 = arith.constant 0 : index
    %c0_55 = arith.constant 0 : index
    %118 = vector.load %arg12[%c0_54, %c0_55] : memref<1x1xf32, #tpu.memory_space<vmem>>, vector<1x1xf32>
    tpu.vector_store %arg12[%c0_54, %c0_55], %117 {strides = array<i32>} : memref<1x1xf32, #tpu.memory_space<vmem>>, vector<1x1xf32>,
    return
  }
}

</mosaic_0001>

<bundles_post_ra>
// kernel: forward.2
= control target key start
LH: loop header
LB: loop body
LE: loop exit
PB: predicated region body
PF: predicated region fallthrough
CT: control target
= control target key end

     0   :  { %s570_s0 = inlined_call_operand.vmem [shape: f32[72,512], index: 0, kind: input, shape index: {}, may-alias: {0,2}]   ;;  %s571_s1 = inlined_call_operand.vmem [shape: f32[72,512], index: 1, kind: input, shape index: {}]   ;;  %s572_s2 = inlined_call_operand.vmem [shape: f32[72,512], index: 2, kind: output, shape index: {}, may-alias: {0,2}]  }
   0x1   :  { %v11_v0 = vld [vmem:[%s570_s0] sm:$0xff]  ;;  %v12_v2 = vld [vmem:[%s570_s0 + $0x8] sm:$0xff]  ;;  %v13_v7 = vld [vmem:[%s570_s0 + $0x10] sm:$0xff] }
   0x2   :  { %v83_v1 = vld [vmem:[%s571_s1] sm:$0xff]  ;;  %v47_v3 = vmul.f32 0.995, %v11_v0  ;;  %v48_v5 = vmul.f32 0.995, %v12_v2  ;;  %v84_v6 = vld [vmem:[%s571_s1 + $0x8] sm:$0xff] }
   0x3   :  { %v119_v4 = vmul.f32 0.005, %v83_v1  ;;  %v85_v8 = vld [vmem:[%s571_s1 + $0x10] sm:$0xff]  ;;  %v120_v10 = vmul.f32 0.005, %v84_v6  ;;  %v14_v13 = vld [vmem:[%s570_s0 + $0x18] sm:$0xff] }
   0x4   :  { %v49_v11 = vmul.f32 0.995, %v13_v7  ;;  %v121_v12 = vmul.f32 0.005, %v85_v8  ;;  %v86_v14 = vld [vmem:[%s571_s1 + $0x18] sm:$0xff]  ;;  %v15_v15 = vld [vmem:[%s570_s0 + $0x20] sm:$0xff] }
   0x5   :  { %v155_v9 = vadd.f32 %v119_v4, %v47_v3  ;;  %v156_v16 = vadd.f32 %v120_v10, %v48_v5  ;;  %v50_v18 = vmul.f32 0.995, %v14_v13  ;;  %v122_v19 = vmul.f32 0.005, %v86_v14  ;;  %v87_v20 = vld [vmem:[%s571_s1 + $0x20] sm:$0xff]  ;;  %v88_v26 = vld [vmem:[%s571_s1 + $0x28] sm:$0xff] }
   0x6   :  { %v157_v17 = vadd.f32 %v121_v12, %v49_v11  ;;  %v51_v22 = vmul.f32 0.995, %v15_v15  ;;  %v123_v23 = vmul.f32 0.005, %v87_v20  ;;  %v89_v28 = vld [vmem:[%s571_s1 + $0x30] sm:$0xff]  ;;  %v90_v35 = vld [vmem:[%s571_s1 + $0x38] sm:$0xff] }
   0x7   :  { %191 = vst [vmem:[%s572_s2] sm:$0xff] %v155_v9  ;;  %v158_v25 = vadd.f32 %v122_v19, %v50_v18  ;;  %v124_v30 = vmul.f32 0.005, %v88_v26  ;;  %v125_v33 = vmul.f32 0.005, %v89_v28  ;;  %v126_v37 = vmul.f32 0.005, %v90_v35 }
   0x8   :  { %v159_v29 = vadd.f32 %v123_v23, %v51_v22  ;;  %v91_v39 = vld [vmem:[%s571_s1 + $0x40] sm:$0xff]  ;;  %v92_v46 = vld [vmem:[%s571_s1 + $0x48] sm:$0xff]  ;;  %v93_v48 = vld [vmem:[%s571_s1 + $0x50] sm:$0xff] }
   0x9   :  { %v127_v43 = vmul.f32 0.005, %v91_v39  ;;  %v128_v50 = vmul.f32 0.005, %v92_v46  ;;  %v129_v53 = vmul.f32 0.005, %v93_v48 }
   0xa   :  { %v94_v55 = vld [vmem:[%s571_s1 + $0x58] sm:$0xff]  ;;  %v95_v59 = vld [vmem:[%s571_s1 + $0x60] sm:$0xff]  ;;  %v96_v2 = vld [vmem:[%s571_s1 + $0x68] sm:$0xff] }
   0xb   :  { %v130_v57 = vmul.f32 0.005, %v94_v55  ;;  %v131_v63 = vmul.f32 0.005, %v95_v59  ;;  %v97_v4 = vld [vmem:[%s571_s1 + $0x70] sm:$0xff]  ;;  %v98_v11 = vld [vmem:[%s571_s1 + $0x78] sm:$0xff] }
   0xc   :  { %v132_v6 = vmul.f32 0.005, %v96_v2  ;;  %v133_v9 = vmul.f32 0.005, %v97_v4  ;;  %v134_v13 = vmul.f32 0.005, %v98_v11 }
   0xd   :  { %v99_v15 = vld [vmem:[%s571_s1 + $0x80] sm:$0xff]  ;;  %v100_v22 = vld [vmem:[%s571_s1 + $0x88] sm:$0xff] }
   0xe   :  { %v16_v21 = vld [vmem:[%s570_s0 + $0x28] sm:$0xff]  ;;  %v135_v19 = vmul.f32 0.005, %v99_v15  ;;  %v136_v26 = vmul.f32 0.005, %v100_v22  ;;  %v103_v35 = vld [vmem:[%s571_s1 + $0xa0] sm:$0xff] }
   0xf   :  { %v52_v24 = vmul.f32 0.995, %v16_v21  ;;  %192 = vst [vmem:[%s572_s2 + $0x8] sm:$0xff] %v156_v16  ;;  %v139_v39 = vmul.f32 0.005, %v103_v35  ;;  %v107_v55 = vld [vmem:[%s571_s1 + $0xc0] sm:$0xff] }
  0x10   :  { %v143_v59 = vmul.f32 0.005, %v107_v55  ;;  %v111_v11 = vld [vmem:[%s571_s1 + $0xe0] sm:$0xff] }
  0x11   :  { %v160_v36 = vadd.f32 %v124_v30, %v52_v24  ;;  %v101_v24 = vld [vmem:[%s571_s1 + $0x90] sm:$0xff]  ;;  %v147_v15 = vmul.f32 0.005, %v111_v11 }
  0x16   :  { %v17_v27 = vld [vmem:[%s570_s0 + $0x30] sm:$0xff] }
  0x17   :  { %193 = vst [vmem:[%s572_s2 + $0x10] sm:$0xff] %v157_v17  ;;  %v53_v31 = vmul.f32 0.995, %v17_v27 }
  0x19   :  { %v161_v41 = vadd.f32 %v125_v33, %v53_v31  ;;  %v102_v31 = vld [vmem:[%s571_s1 + $0x98] sm:$0xff] }
  0x1a   :  { %v138_v33 = vmul.f32 0.005, %v102_v31  ;;  %v115_v31 = vld [vmem:[%s571_s1 + $0x100] sm:$0xff] }
  0x1b   :  { %v151_v35 = vmul.f32 0.005, %v115_v31 }
  0x1e   :  { %v18_v32 = vld [vmem:[%s570_s0 + $0x38] sm:$0xff] }
  0x1f   :  { %194 = vst [vmem:[%s572_s2 + $0x18] sm:$0xff] %v158_v25  ;;  %v54_v34 = vmul.f32 0.995, %v18_v32 }
  0x20   :  { %195 = vst [vmem:[%s572_s2 + $0x20] sm:$0xff] %v159_v29  ;;  %v137_v29 = vmul.f32 0.005, %v101_v24 }
  0x21   :  { %v162_v45 = vadd.f32 %v126_v37, %v54_v34 }
  0x27   :  { %v19_v38 = vld [vmem:[%s570_s0 + $0x40] sm:$0xff]  ;;  %v20_v40 = vld [vmem:[%s570_s0 + $0x48] sm:$0xff] }
  0x28   :  { %v55_v42 = vmul.f32 0.995, %v19_v38  ;;  %v56_v44 = vmul.f32 0.995, %v20_v40  ;;  %196 = vst [vmem:[%s572_s2 + $0x28] sm:$0xff] %v160_v36 }
  0x2a   :  { %v163_v49 = vadd.f32 %v127_v43, %v55_v42  ;;  %v164_v56 = vadd.f32 %v128_v50, %v56_v44  ;;  %v104_v42 = vld [vmem:[%s571_s1 + $0xa8] sm:$0xff]  ;;  %v105_v44 = vld [vmem:[%s571_s1 + $0xb0] sm:$0xff] }
  0x2b   :  { %v140_v46 = vmul.f32 0.005, %v104_v42 }
  0x2f   :  { %v21_v47 = vld [vmem:[%s570_s0 + $0x50] sm:$0xff] }
  0x30   :  { %197 = vst [vmem:[%s572_s2 + $0x30] sm:$0xff] %v161_v41  ;;  %v57_v51 = vmul.f32 0.995, %v21_v47 }
  0x32   :  { %v165_v61 = vadd.f32 %v129_v53, %v57_v51  ;;  %v106_v51 = vld [vmem:[%s571_s1 + $0xb8] sm:$0xff] }
  0x33   :  { %v142_v53 = vmul.f32 0.005, %v106_v51 }
  0x37   :  { %v22_v52 = vld [vmem:[%s570_s0 + $0x58] sm:$0xff] }
  0x38   :  { %198 = vst [vmem:[%s572_s2 + $0x38] sm:$0xff] %v162_v45  ;;  %v58_v54 = vmul.f32 0.995, %v22_v52 }
  0x39   :  { %199 = vst [vmem:[%s572_s2 + $0x40] sm:$0xff] %v163_v49  ;;  %v141_v49 = vmul.f32 0.005, %v105_v44 }
  0x3a   :  { %v166_v1 = vadd.f32 %v130_v57, %v58_v54 }
  0x40   :  { %v23_v58 = vld [vmem:[%s570_s0 + $0x60] sm:$0xff]  ;;  %v24_v60 = vld [vmem:[%s570_s0 + $0x68] sm:$0xff] }
  0x41   :  { %v59_v62 = vmul.f32 0.995, %v23_v58  ;;  %v60_v0 = vmul.f32 0.995, %v24_v60  ;;  %200 = vst [vmem:[%s572_s2 + $0x48] sm:$0xff] %v164_v56 }
  0x43   :  { %v167_v5 = vadd.f32 %v131_v63, %v59_v62  ;;  %v168_v12 = vadd.f32 %v132_v6, %v60_v0  ;;  %v108_v62 = vld [vmem:[%s571_s1 + $0xc8] sm:$0xff]  ;;  %v109_v0 = vld [vmem:[%s571_s1 + $0xd0] sm:$0xff] }
  0x44   :  { %v144_v2 = vmul.f32 0.005, %v108_v62 }
  0x48   :  { %v25_v3 = vld [vmem:[%s570_s0 + $0x70] sm:$0xff] }
  0x49   :  { %201 = vst [vmem:[%s572_s2 + $0x50] sm:$0xff] %v165_v61  ;;  %v61_v7 = vmul.f32 0.995, %v25_v3 }
  0x4b   :  { %v169_v17 = vadd.f32 %v133_v9, %v61_v7  ;;  %v110_v7 = vld [vmem:[%s571_s1 + $0xd8] sm:$0xff] }
  0x4c   :  { %v146_v9 = vmul.f32 0.005, %v110_v7 }
  0x50   :  { %v26_v8 = vld [vmem:[%s570_s0 + $0x78] sm:$0xff] }
  0x51   :  { %202 = vst [vmem:[%s572_s2 + $0x58] sm:$0xff] %v166_v1  ;;  %v62_v10 = vmul.f32 0.995, %v26_v8 }
  0x52   :  { %203 = vst [vmem:[%s572_s2 + $0x60] sm:$0xff] %v167_v5  ;;  %v145_v5 = vmul.f32 0.005, %v109_v0 }
  0x53   :  { %v170_v21 = vadd.f32 %v134_v13, %v62_v10 }
  0x59   :  { %v27_v14 = vld [vmem:[%s570_s0 + $0x80] sm:$0xff]  ;;  %v28_v16 = vld [vmem:[%s570_s0 + $0x88] sm:$0xff] }
  0x5a   :  { %v63_v18 = vmul.f32 0.995, %v27_v14  ;;  %v64_v20 = vmul.f32 0.995, %v28_v16  ;;  %204 = vst [vmem:[%s572_s2 + $0x68] sm:$0xff] %v168_v12 }
  0x5c   :  { %v171_v25 = vadd.f32 %v135_v19, %v63_v18  ;;  %v172_v32 = vadd.f32 %v136_v26, %v64_v20  ;;  %v112_v18 = vld [vmem:[%s571_s1 + $0xe8] sm:$0xff]  ;;  %v113_v20 = vld [vmem:[%s571_s1 + $0xf0] sm:$0xff] }
  0x5d   :  { %v148_v22 = vmul.f32 0.005, %v112_v18 }
  0x61   :  { %v29_v23 = vld [vmem:[%s570_s0 + $0x90] sm:$0xff] }
  0x62   :  { %205 = vst [vmem:[%s572_s2 + $0x70] sm:$0xff] %v169_v17  ;;  %v65_v27 = vmul.f32 0.995, %v29_v23 }
  0x64   :  { %v173_v37 = vadd.f32 %v137_v29, %v65_v27  ;;  %v114_v27 = vld [vmem:[%s571_s1 + $0xf8] sm:$0xff] }
  0x65   :  { %v150_v29 = vmul.f32 0.005, %v114_v27 }
  0x69   :  { %v30_v28 = vld [vmem:[%s570_s0 + $0x98] sm:$0xff] }
  0x6a   :  { %206 = vst [vmem:[%s572_s2 + $0x78] sm:$0xff] %v170_v21  ;;  %v66_v30 = vmul.f32 0.995, %v30_v28 }
  0x6b   :  { %207 = vst [vmem:[%s572_s2 + $0x80] sm:$0xff] %v171_v25  ;;  %v149_v25 = vmul.f32 0.005, %v113_v20 }
  0x6c   :  { %v174_v41 = vadd.f32 %v138_v33, %v66_v30 }
  0x72   :  { %v31_v34 = vld [vmem:[%s570_s0 + $0xa0] sm:$0xff]  ;;  %v32_v36 = vld [vmem:[%s570_s0 + $0xa8] sm:$0xff] }
  0x73   :  { %v67_v38 = vmul.f32 0.995, %v31_v34  ;;  %v68_v40 = vmul.f32 0.995, %v32_v36  ;;  %208 = vst [vmem:[%s572_s2 + $0x88] sm:$0xff] %v172_v32 }
  0x75   :  { %v175_v45 = vadd.f32 %v139_v39, %v67_v38  ;;  %v176_v52 = vadd.f32 %v140_v46, %v68_v40  ;;  %v116_v38 = vld [vmem:[%s571_s1 + $0x108] sm:$0xff]  ;;  %v117_v40 = vld [vmem:[%s571_s1 + $0x110] sm:$0xff] }
  0x76   :  { %v152_v42 = vmul.f32 0.005, %v116_v38 }
  0x7a   :  { %v33_v43 = vld [vmem:[%s570_s0 + $0xb0] sm:$0xff] }
  0x7b   :  { %209 = vst [vmem:[%s572_s2 + $0x90] sm:$0xff] %v173_v37  ;;  %v69_v47 = vmul.f32 0.995, %v33_v43 }
  0x7d   :  { %v177_v57 = vadd.f32 %v141_v49, %v69_v47  ;;  %v118_v47 = vld [vmem:[%s571_s1 + $0x118] sm:$0xff] }
  0x7e   :  { %v154_v49 = vmul.f32 0.005, %v118_v47 }
  0x82   :  { %v34_v48 = vld [vmem:[%s570_s0 + $0xb8] sm:$0xff] }
  0x83   :  { %210 = vst [vmem:[%s572_s2 + $0x98] sm:$0xff] %v174_v41  ;;  %v70_v50 = vmul.f32 0.995, %v34_v48 }
  0x84   :  { %211 = vst [vmem:[%s572_s2 + $0xa0] sm:$0xff] %v175_v45  ;;  %v153_v45 = vmul.f32 0.005, %v117_v40 }
  0x85   :  { %v178_v61 = vadd.f32 %v142_v53, %v70_v50 }
  0x8b   :  { %v35_v54 = vld [vmem:[%s570_s0 + $0xc0] sm:$0xff]  ;;  %v36_v56 = vld [vmem:[%s570_s0 + $0xc8] sm:$0xff] }
  0x8c   :  { %v71_v58 = vmul.f32 0.995, %v35_v54  ;;  %v72_v60 = vmul.f32 0.995, %v36_v56  ;;  %212 = vst [vmem:[%s572_s2 + $0xa8] sm:$0xff] %v176_v52 }
  0x8e   :  { %v179_v1 = vadd.f32 %v143_v59, %v71_v58  ;;  %v180_v8 = vadd.f32 %v144_v2, %v72_v60 }
  0x93   :  { %v37_v63 = vld [vmem:[%s570_s0 + $0xd0] sm:$0xff] }
  0x94   :  { %213 = vst [vmem:[%s572_s2 + $0xb0] sm:$0xff] %v177_v57  ;;  %v73_v3 = vmul.f32 0.995, %v37_v63 }
  0x96   :  { %v181_v13 = vadd.f32 %v145_v5, %v73_v3 }
  0x9b   :  { %v38_v4 = vld [vmem:[%s570_s0 + $0xd8] sm:$0xff] }
  0x9c   :  { %214 = vst [vmem:[%s572_s2 + $0xb8] sm:$0xff] %v178_v61  ;;  %v74_v6 = vmul.f32 0.995, %v38_v4 }
  0x9d   :  { %215 = vst [vmem:[%s572_s2 + $0xc0] sm:$0xff] %v179_v1 }
  0x9e   :  { %v182_v17 = vadd.f32 %v146_v9, %v74_v6 }
  0xa4   :  { %v39_v10 = vld [vmem:[%s570_s0 + $0xe0] sm:$0xff]  ;;  %v40_v12 = vld [vmem:[%s570_s0 + $0xe8] sm:$0xff] }
  0xa5   :  { %v75_v14 = vmul.f32 0.995, %v39_v10  ;;  %v76_v16 = vmul.f32 0.995, %v40_v12  ;;  %216 = vst [vmem:[%s572_s2 + $0xc8] sm:$0xff] %v180_v8 }
  0xa7   :  { %v183_v21 = vadd.f32 %v147_v15, %v75_v14  ;;  %v184_v28 = vadd.f32 %v148_v22, %v76_v16 }
  0xac   :  { %v41_v19 = vld [vmem:[%s570_s0 + $0xf0] sm:$0xff] }
  0xad   :  { %217 = vst [vmem:[%s572_s2 + $0xd0] sm:$0xff] %v181_v13  ;;  %v77_v23 = vmul.f32 0.995, %v41_v19 }
  0xaf   :  { %v185_v33 = vadd.f32 %v149_v25, %v77_v23 }
  0xb4   :  { %v42_v24 = vld [vmem:[%s570_s0 + $0xf8] sm:$0xff] }
  0xb5   :  { %218 = vst [vmem:[%s572_s2 + $0xd8] sm:$0xff] %v182_v17  ;;  %v78_v26 = vmul.f32 0.995, %v42_v24 }
  0xb6   :  { %219 = vst [vmem:[%s572_s2 + $0xe0] sm:$0xff] %v183_v21 }
  0xb7   :  { %v186_v37 = vadd.f32 %v150_v29, %v78_v26 }
  0xbd   :  { %v43_v30 = vld [vmem:[%s570_s0 + $0x100] sm:$0xff]  ;;  %v44_v32 = vld [vmem:[%s570_s0 + $0x108] sm:$0xff] }
  0xbe   :  { %v79_v34 = vmul.f32 0.995, %v43_v30  ;;  %v80_v36 = vmul.f32 0.995, %v44_v32  ;;  %220 = vst [vmem:[%s572_s2 + $0xe8] sm:$0xff] %v184_v28 }
  0xc0   :  { %v187_v41 = vadd.f32 %v151_v35, %v79_v34  ;;  %v188_v48 = vadd.f32 %v152_v42, %v80_v36 }
  0xc5   :  { %v45_v39 = vld [vmem:[%s570_s0 + $0x110] sm:$0xff] }
  0xc6   :  { %221 = vst [vmem:[%s572_s2 + $0xf0] sm:$0xff] %v185_v33  ;;  %v81_v43 = vmul.f32 0.995, %v45_v39 }
  0xc8   :  { %v189_v50 = vadd.f32 %v153_v45, %v81_v43 }
  0xcd   :  { %v46_v44 = vld [vmem:[%s570_s0 + $0x118] sm:$0xff] }
  0xce   :  { %222 = vst [vmem:[%s572_s2 + $0xf8] sm:$0xff] %v186_v37  ;;  %v82_v46 = vmul.f32 0.995, %v46_v44 }
  0xcf   :  { %223 = vst [vmem:[%s572_s2 + $0x100] sm:$0xff] %v187_v41 }
  0xd0   :  { %224 = vst [vmem:[%s572_s2 + $0x108] sm:$0xff] %v188_v48  ;;  %v190_v51 = vadd.f32 %v154_v49, %v82_v46 }
  0xd1   :  { %225 = vst [vmem:[%s572_s2 + $0x110] sm:$0xff] %v189_v50 }
  0xd2   :  { %226 = vst [vmem:[%s572_s2 + $0x118] sm:$0xff] %v190_v51 }

// kernel: forward.3
= control target key start
LH: loop header
LB: loop body
LE: loop exit
PB: predicated region body
PF: predicated region fallthrough
CT: control target
= control target key end

     0   :  { %vm51_vm0 = vcmask 261120   ;;  %s603_s0 = inlined_call_operand.vmem [shape: f32[8,32], index: 0, kind: input, shape index: {}]   ;;  %s604_s1 = inlined_call_operand.vmem [shape: f32[8,32], index: 1, kind: input, shape index: {}]   ;;  %s605_s2 = inlined_call_operand.vmem [shape: f32[8,32], index: 2, kind: input, shape index: {}]   ;;  %s606_s3 = inlined_call_operand.vmem [shape: f32[8,32], index: 3, kind: input, shape index: {}]   ;;  %s607_s4 = inlined_call_operand.vmem [shape: f32[32,128], index: 4, kind: input, shape index: {}]   ;;  %s608_s5 = inlined_call_operand.vmem [shape: f32[32,128], index: 5, kind: input, shape index: {}]   ;;  %s609_s6 = inlined_call_operand.vmem [shape: f32[32,128], index: 6, kind: input, shape index: {}]   ;;  %s610_s7 = inlined_call_operand.vmem [shape: f32[32,128], index: 7, kind: input, shape index: {}]   ;;  %s611_s8 = inlined_call_operand.vmem [shape: f32[1,128], index: 8, kind: input, shape index: {}]   ;;  %s612_s9 = inlined_call_operand.vmem [shape: f32[1,128], index: 9, kind: input, shape index: {}]   ;;  %s613_s10 = inlined_call_operand.vmem [shape: f32[1,128], index: 10, kind: input, shape index: {}]   ;;  %s614_s11 = inlined_call_operand.vmem [shape: f32[1,128], index: 11, kind: input, shape index: {}]   ;;  %s615_s12 = inlined_call_operand.hbm [shape: f32[1,1], index: 12, kind: output, shape index: {}]  }
   0x1   :  { %v95_v0 = vld [vmem:[%s608_s5 + $0x18] sm:$0xff]  ;;  %v94_v2 = vld [vmem:[%s608_s5 + $0x10] sm:$0xff]  ;;  %v93_v5 = vld [vmem:[%s608_s5 + $0x8] sm:$0xff] }
   0x2   :  { %v190_v1 = vld [vmem:[%s610_s7 + $0x18] sm:$0xff]  ;;  %115 = vmatpush.msra.mxu1 %v95_v0  ;;  %v189_v4 = vld [vmem:[%s610_s7 + $0x10] sm:$0xff]  ;;  %v188_v7 = vld [vmem:[%s610_s7 + $0x8] sm:$0xff] }
   0x3   :  { %210 = vmatpush.msra.mxu3 %v190_v1  ;;  %v142_v3 = vld [vmem:[%s609_s6 + $0x18] sm:$0xff]  ;;  %v141_v6 = vld [vmem:[%s609_s6 + $0x10] sm:$0xff]  ;;  %v140_v8 = vld [vmem:[%s609_s6 + $0x8] sm:$0xff] }
   0x4   :  { %162 = vmatpush.msra.mxu2 %v142_v3  ;;  %116 = vmatpush.msra.mxu1 %v94_v2  ;;  %v92_v9 = vld [vmem:[%s608_s5] sm:$0xff]  ;;  %v46_v13 = vld [vmem:[%s607_s4 + $0x18] sm:$0xff]  ;;  %v45_v15 = vld [vmem:[%s607_s4 + $0x10] sm:$0xff] }
   0x5   :  { %211 = vmatpush.msra.mxu3 %v189_v4  ;;  %v187_v10 = vld [vmem:[%s610_s7] sm:$0xff]  ;;  %67 = vmatpush.msra.mxu0 %v46_v13  ;;  %v44_v17 = vld [vmem:[%s607_s4 + $0x8] sm:$0xff] }
   0x6   :  { %163 = vmatpush.msra.mxu2 %v141_v6  ;;  %117 = vmatpush.msra.mxu1 %v93_v5  ;;  %v91_v11 = vld [vmem:[%s604_s1] sm:$0xff] }
   0x7   :  { %212 = vmatpush.msra.mxu3 %v188_v7  ;;  %v186_v12 = vld [vmem:[%s606_s3] sm:$0xff] }
   0x8   :  { %164 = vmatpush.msra.mxu2 %v140_v8  ;;  %v139_v14 = vld [vmem:[%s609_s6] sm:$0xff]  ;;  %118 = vmatpush.msra.mxu1 %v92_v9 }
   0x9   :  { %213 = vmatpush.msra.mxu3 %v187_v10  ;;  %v138_v16 = vld [vmem:[%s605_s2] sm:$0xff]  ;;  %389 = vmatmul.msk.f32.vlgmr.msra.gmra.mxu1 %vm51_vm0, %v91_v11 }
   0xa   :  { %391 = vmatmul.msk.f32.vlgmr.msra.gmra.mxu3 %vm51_vm0, %v186_v12 }
   0xb   :  { %17 = vsyncpa [#allocation3], 0  ;;  %165 = vmatpush.msra.mxu2 %v139_v14  ;;  %68 = vmatpush.msra.mxu0 %v45_v15  ;;  %v43_v18 = vld [vmem:[%s607_s4] sm:$0xff]  ;;  %vm256_vm13 = vcmask 64512   ;;  %s379_s25 = sshll.u32 %s615_s12, 4  ;;  %vm370_vm15 = vcmask 0   ;;  %s380_s25 = int_to_ptr.hbm [resolvable:$true] %s379_s25 }
   0xc   :  { %390 = vmatmul.msk.f32.vlgmr.msra.gmra.mxu2 %vm51_vm0, %v138_v16  ;;  %v42_v19 = vld [vmem:[%s603_s0] sm:$0xff] }
   0xd   :  { %69 = vmatpush.msra.mxu0 %v44_v17  ;;  %v394_v20 = vld [vmem:[%s612_s9] ss:$0 sm:$0xff] }
   0xe   :  { %v395_v24 = vld [vmem:[%s614_s11] ss:$0 sm:$0xff] }
   0xf   :  { %70 = vmatpush.msra.mxu0 %v43_v18  ;;  %v396_v25 = vld [vmem:[%s613_s10] ss:$0 sm:$0xff] }
  0x10   :  { %388 = vmatmul.msk.f32.vlgmr.msra.gmra.mxu0 %vm51_vm0, %v42_v19  ;;  %v397_v28 = vld [vmem:[%s611_s8] ss:$0 sm:$0xff]  ;;  %s447_s8 = smov [#allocation2]  }
  0x11   :  { %s377_s9 = sshll.u32 %s447_s8, 4  ;;  %s378_s9 = int_to_ptr.vmem [resolvable:$true] %s377_s9 }
  0x86   :  { %v120_v21 = vpop.f32.mrf.mxu1 }
  0x87   :  { %v121_v22 = vadd.f32 %v394_v20, %v120_v21 }
  0x89   :  { %v123_v23 = vmul.f32 %v121_v22, %v121_v22 }
  0x8b   :  { %124 = vadd.xlane.f32.xlu0 %v123_v23 }
  0x8d   :  { %v215_v26 = vpop.f32.mrf.mxu3  ;;  %v72_v30 = vpop.f32.mrf.mxu0 }
  0x8e   :  { %v216_v27 = vadd.f32 %v395_v24, %v215_v26  ;;  %v589_v34 = vadd.f32 %v397_v28, %v72_v30 }
  0x8f   :  { %v167_v29 = vpop.f32.mrf.mxu2 }
  0x90   :  { %v168_v31 = vadd.f32 %v396_v25, %v167_v29  ;;  %v218_v32 = vmul.f32 %v216_v27, %v216_v27  ;;  %v75_v35 = vmul.f32 %v589_v34, %v589_v34 }
  0x92   :  { %219 = vadd.xlane.f32.xlu1 %v218_v32  ;;  %v170_v33 = vmul.f32 %v168_v31, %v168_v31 }
  0x94   :  { %171 = vadd.xlane.f32.xlu0 %v170_v33 }
  0x9a   :  { %76 = vadd.xlane.f32.xlu1 %v75_v35 }
  0xfe   :  { %v125_v36 = vpop.xlane.xlu0 %124 }
  0xff   :  { %v126_v37 = vmax.f32 %v125_v36, 1e-24 }
 0x101   :  { %398 = vrsqrt.f32 %v126_v37  ;;  %vm133_vm1 = vweird.f32 %v126_v37 }
 0x105   :  { %v220_v38 = vpop.xlane.xlu1 %219 }
 0x106   :  { %v221_v39 = vmax.f32 %v220_v38, 1e-24 }
 0x107   :  { %v172_v40 = vpop.xlane.xlu0 %171  ;;  %v399_v41 = vpop.eup %398 }
 0x108   :  { %400 = vrsqrt.f32 %v221_v39  ;;  %v173_v42 = vmax.f32 %v172_v40, 1e-24  ;;  %v128_v43 = vmul.f32 %v399_v41, %v126_v37  ;;  %vm134_vm2 = vweird.f32 %v399_v41 }
 0x109   :  { %vm135_vm3 = vmor %vm133_vm1, %vm134_vm2  ;;  %vm228_vm5 = vweird.f32 %v221_v39 }
 0x10a   :  { %402 = vrsqrt.f32 %v173_v42  ;;  %v129_v44 = vmul.f32 %v399_v41, %v128_v43  ;;  %vm180_vm6 = vweird.f32 %v173_v42 }
 0x10c   :  { %v130_v45 = vmul.f32 0.5, %v129_v44 }
 0x10d   :  { %v77_v46 = vpop.xlane.xlu1 %76 }
 0x10e   :  { %v401_v47 = vpop.eup %400  ;;  %v78_v48 = vmax.f32 %v77_v46, 1e-24  ;;  %v131_v49 = vsub.f32 1.5, %v130_v45  ;;  %v446_v46 = vmov 24.0  }
 0x10f   :  { %v223_v50 = vmul.f32 %v401_v47, %v221_v39  ;;  %vm229_vm4 = vweird.f32 %v401_v47 }
 0x110   :  { %v403_v51 = vpop.eup %402  ;;  %404 = vrsqrt.f32 %v78_v48  ;;  %v132_v52 = vmul.f32 %v399_v41, %v131_v49  ;;  %vm230_vm8 = vmor %vm228_vm5, %vm229_vm4  ;;  %vm85_vm11 = vweird.f32 %v78_v48 }
 0x111   :  { %v224_v53 = vmul.f32 %v401_v47, %v223_v50  ;;  %v175_v54 = vmul.f32 %v403_v51, %v173_v42  ;;  %vm181_vm7 = vweird.f32 %v403_v51 }
 0x112   :  { %v136_v55 = vsel %vm135_vm3, %v399_v41, %v132_v52  ;;  %vm182_vm9 = vmor %vm180_vm6, %vm181_vm7 }
 0x113   :  { %v225_v56 = vmul.f32 0.5, %v224_v53  ;;  %v176_v57 = vmul.f32 %v403_v51, %v175_v54  ;;  %v137_v58 = vmul.f32 %v136_v55, %v121_v22 }
 0x115   :  { %v226_v59 = vsub.f32 1.5, %v225_v56  ;;  %v177_v60 = vmul.f32 0.5, %v176_v57  ;;  %248 = vmatpush.xpose.msrb.mxu0 %v137_v58  ;;  %334 = vmatpush.xpose.msrb.mxu2 %v137_v58 }
 0x116   :  { %v405_v61 = vpop.eup %404 }
 0x117   :  { %v178_v62 = vsub.f32 1.5, %v177_v60  ;;  %v80_v63 = vmul.f32 %v405_v61, %v78_v48  ;;  %v227_v0 = vmul.f32 %v401_v47, %v226_v59  ;;  %vm86_vm10 = vweird.f32 %v405_v61 }
 0x118   :  { %vm87_vm12 = vmor %vm85_vm11, %vm86_vm10 }
 0x119   :  { %v179_v1 = vmul.f32 %v403_v51, %v178_v62  ;;  %v81_v2 = vmul.f32 %v405_v61, %v80_v63  ;;  %v231_v3 = vsel %vm230_vm8, %v401_v47, %v227_v0 }
 0x11a   :  { %v232_v4 = vmul.f32 %v231_v3, %v216_v27 }
 0x11b   :  { %v82_v5 = vmul.f32 0.5, %v81_v2  ;;  %v183_v6 = vsel %vm182_vm9, %v403_v51, %v179_v1 }
 0x11c   :  { %291 = vmatpush.xpose.msrb.mxu1 %v232_v4  ;;  %v184_v7 = vmul.f32 14.285714, %v183_v6 }
 0x11d   :  { %v83_v8 = vsub.f32 1.5, %v82_v5 }
 0x11e   :  { %v185_v9 = vmul.f32 %v184_v7, %v168_v31 }
 0x11f   :  { %v84_v10 = vmul.f32 %v405_v61, %v83_v8 }
 0x120   :  { %335 = vmatmul.f32.vlgmr.msrb.gmra.mxu2 %v185_v9  ;;  %v339_v11 = vmul.f32 %v185_v9, %v137_v58 }
 0x121   :  { %v88_v12 = vsel %vm87_vm12, %v405_v61, %v84_v10 }
 0x122   :  { %v89_v13 = vmul.f32 14.285714, %v88_v12 }
 0x124   :  { %v90_v14 = vmul.f32 %v89_v13, %v589_v34 }
 0x126   :  { %249 = vmatmul.f32.vlgmr.msrb.gmra.mxu0 %v90_v14  ;;  %292 = vmatmul.f32.vlgmr.msrb.gmra.mxu1 %v90_v14  ;;  %v253_v15 = vmul.f32 %v137_v58, %v90_v14  ;;  %v296_v16 = vmul.f32 %v232_v4, %v90_v14 }
 0x1a3   :  { %v250_v17 = vpop.f32.mrf.mxu0  ;;  %v336_v18 = vpop.f32.mrf.mxu2 }
 0x1a4   :  { %v257_v19 = vsel %vm256_vm13, %v250_v17, -inf  ;;  %v342_v20 = vsel %vm256_vm13, %v336_v18, -inf  ;;  %v293_v21 = vpop.f32.mrf.mxu1 }
 0x1a5   :  { %258 = vmax.xlane.f32.xlu2 %v257_v19  ;;  %343 = vmax.xlane.f32.xlu0 %v342_v20  ;;  %v299_v22 = vsel %vm256_vm13, %v293_v21, -inf }
 0x1ad   :  { %300 = vmax.xlane.f32.xlu2 %v299_v22 }
 0x218   :  { %v259_v23 = vpop.xlane.xlu2 %258  ;;  %v344_v24 = vpop.xlane.xlu0 %343 }
 0x219   :  { %v260_v25 = vsub.f32 %v250_v17, %v259_v23  ;;  %v345_v26 = vsub.f32 %v336_v18, %v344_v24 }
 0x21b   :  { %v261_v27 = vmul.f32 1.442695, %v260_v25  ;;  %v346_v28 = vmul.f32 1.442695, %v345_v26 }
 0x21d   :  { %406 = vpow2.f32 %v261_v27 }
 0x21e   :  { %408 = vpow2.f32 %v346_v28 }
 0x220   :  { %v301_v29 = vpop.xlane.xlu2 %300 }
 0x221   :  { %v302_v30 = vsub.f32 %v293_v21, %v301_v29 }
 0x223   :  { %v407_v31 = vpop.eup %406  ;;  %v303_v32 = vmul.f32 1.442695, %v302_v30 }
 0x224   :  { %v409_v33 = vpop.eup %408  ;;  %v263_v34 = vsel %vm256_vm13, %v407_v31, 0.0 }
 0x225   :  { %410 = vpow2.f32 %v303_v32  ;;  %v348_v35 = vsel %vm256_vm13, %v409_v33, 0.0  ;;  %264 = vadd.xlane.f32.xlu1 %v263_v34 }
 0x226   :  { %349 = vadd.xlane.f32.xlu0 %v348_v35 }
 0x22b   :  { %v411_v36 = vpop.eup %410 }
 0x22c   :  { %v305_v37 = vsel %vm256_vm13, %v411_v36, 0.0 }
 0x22d   :  { %254 = vadd.xlane.f32.xlu1 %v253_v15  ;;  %306 = vadd.xlane.f32.xlu2 %v305_v37 }
 0x22e   :  { %340 = vadd.xlane.f32.xlu0 %v339_v11 }
 0x235   :  { %297 = vadd.xlane.f32.xlu2 %v296_v16 }
 0x298   :  { %v265_v38 = vpop.xlane.xlu1 %264 }
 0x299   :  { %v350_v39 = vpop.xlane.xlu0 %349  ;;  %412 = vlog2.f32 %v265_v38 }
 0x29a   :  { %414 = vlog2.f32 %v350_v39 }
 0x29f   :  { %v413_v40 = vpop.eup %412 }
 0x2a0   :  { %v415_v41 = vpop.eup %414  ;;  %v267_v42 = vmul.f32 0.6931472, %v413_v40  ;;  %v307_v43 = vpop.xlane.xlu2 %306 }
 0x2a1   :  { %v352_v44 = vmul.f32 0.6931472, %v415_v41  ;;  %416 = vlog2.f32 %v307_v43  ;;  %v255_v48 = vpop.xlane.xlu1 %254  ;;  %v341_v49 = vpop.xlane.xlu0 %340 }
 0x2a2   :  { %v268_v45 = vadd.f32 %v267_v42, %v259_v23  ;;  %418 = vrcp.f32 %v446_v46 }
 0x2a3   :  { %v353_v47 = vadd.f32 %v352_v44, %v344_v24 }
 0x2a4   :  { %v269_v50 = vsub.f32 %v268_v45, %v255_v48 }
 0x2a5   :  { %v354_v51 = vsub.f32 %v353_v47, %v341_v49 }
 0x2a6   :  { %v270_v52 = vrot.slane %v269_v50, 4 }
 0x2a7   :  { %v417_v53 = vpop.eup %416  ;;  %v355_v54 = vrot.slane %v354_v51, 4 }
 0x2a8   :  { %v419_v55 = vpop.eup %418  ;;  %v271_v56 = vadd.f32 %v270_v52, %v269_v50  ;;  %v309_v57 = vmul.f32 0.6931472, %v417_v53  ;;  %v298_v60 = vpop.xlane.xlu2 %297 }
 0x2a9   :  { %v356_v58 = vadd.f32 %v355_v54, %v354_v51  ;;  %v363_v61 = vmul.f32 24.0, %v419_v55  ;;  %vm367_vm14 = vweird.f32 %v419_v55 }
 0x2aa   :  { %v310_v59 = vadd.f32 %v309_v57, %v301_v29  ;;  %v272_v62 = vrot.slane %v271_v56, 2 }
 0x2ab   :  { %v357_v0 = vrot.slane %v356_v58, 2  ;;  %v364_v2 = vsub.f32 1.0, %v363_v61 }
 0x2ac   :  { %v311_v63 = vsub.f32 %v310_v59, %v298_v60  ;;  %v273_v3 = vadd.f32 %v272_v62, %v271_v56 }
 0x2ad   :  { %v358_v5 = vadd.f32 %v357_v0, %v356_v58  ;;  %v365_v7 = vmul.f32 %v419_v55, %v364_v2 }
 0x2ae   :  { %v312_v1 = vrot.slane %v311_v63, 4  ;;  %v274_v8 = vrot.slane %v273_v3, 1 }
 0x2af   :  { %v359_v10 = vrot.slane %v358_v5, 1  ;;  %v366_v12 = vadd.f32 %v419_v55, %v365_v7 }
 0x2b0   :  { %v313_v4 = vadd.f32 %v312_v1, %v311_v63  ;;  %v275_v13 = vadd.f32 %v274_v8, %v273_v3 }
 0x2b1   :  { %v360_v15 = vadd.f32 %v359_v10, %v358_v5  ;;  %v368_v17 = vsel %vm367_vm14, %v419_v55, %v366_v12 }
 0x2b2   :  { %v314_v6 = vrot.slane %v313_v4, 2 }
 0x2b4   :  { %v315_v9 = vadd.f32 %v314_v6, %v313_v4 }
 0x2b6   :  { %v316_v11 = vrot.slane %v315_v9, 1 }
 0x2b8   :  { %v317_v14 = vadd.f32 %v316_v11, %v315_v9 }
 0x2ba   :  { %v318_v16 = vadd.f32 %v317_v14, %v275_v13 }
 0x2bc   :  { %v361_v18 = vadd.f32 %v360_v15, %v318_v16 }
 0x2be   :  { %v369_v19 = vmul.f32 %v368_v17, %v361_v18 }
 0x2c0   :  { %371 = vst.msk [vmem:[#allocation2] sm:$0x1] %vm370_vm15, %v369_v19 }
 0x2c1   :  { %382 = dma.vmem_to_hbm [thread:$0]  %s378_s9, 16, %s380_s25, [#allocation3]  }
 0x2c2   :  { %444 = dma.done.wait [#allocation3], 16  }
 0x2c3   :  { %445 = vsyncadd [#allocation3], 4294967280 }
 0x2c4   :  { %387 = vsyncpa [#allocation3], 1 }

</bundles_post_ra>
